<compile_context>
chip_gen: v6e
topology: v6e:2x2x1
jax: 0.10.0
libtpu: 0.0.40
codegen_flags: <defaults>
</compile_context>

<pallas_src>
import math
from functools import partial

import jax
import jax.numpy as jnp
from jax import lax
from jax.experimental import pallas as pl
from jax.experimental.pallas import tpu as pltpu


def _cross_modal_attn_kernel(xq_ref, xkv_ref, wq_ref, wk_ref, wv_ref, wo_ref,
                             bo_ref, o_ref, *scratch,
                             num_heads, head_dim, cache_kv, bf16_exp):
    # One (batch, q-tile) per grid step.
    xq = xq_ref[0]                                   # (TQ, H)
    mm_dtype = xq.dtype
    use_approx = mm_dtype == jnp.bfloat16
    exp_dtype = jnp.bfloat16 if bf16_exp else jnp.float32

    # Q projection (softmax scale already folded into Wq^T); pops in mm_dtype.
    q = jnp.dot(xq, wq_ref[...], preferred_element_type=mm_dtype)       # (TQ, Hp)

    if cache_kv:
        # K/V projected once per batch (first q-tile) into persistent VMEM scratch.
        k_cache, v_cache = scratch

        @pl.when(pl.program_id(1) == 0)
        def _():
            xkv = xkv_ref[0]                                             # (Skv, H)
            k_cache[...] = jnp.dot(xkv, wk_ref[...],
                                   preferred_element_type=mm_dtype)
            v_cache[...] = jnp.dot(xkv, wv_ref[...],
                                   preferred_element_type=mm_dtype)
        k, v = k_cache, v_cache          # refs; per-head static slices below
    else:
        xkv = xkv_ref[0]
        k = jnp.dot(xkv, wk_ref[...], preferred_element_type=mm_dtype)   # (Skv, Hp)
        v = jnp.dot(xkv, wv_ref[...], preferred_element_type=mm_dtype)

    tq = q.shape[0]
    h_out = o_ref.shape[2]
    acc = jnp.zeros((tq, h_out), jnp.float32)

    # Per-head attention on static lane slices; the output projection is
    # accumulated per head (no concatenate over heads, no head-split transposes).
    for h in range(num_heads):
        lo = h * head_dim
        qh = q[:, lo:lo + head_dim]                                      # (TQ, hd)
        kh = k[:, lo:lo + head_dim]                                      # (Skv, hd)
        vh = v[:, lo:lo + head_dim]                                      # (Skv, hd)

        # scores = qh @ kh^T (contract trailing dims; no transpose materialized).
        s = lax.dot_general(qh, kh, (((1,), (1,)), ((), ())),
                            preferred_element_type=jnp.float32)          # (TQ, Skv)

        # Softmax with deferred normalization; dropout = identity (eval mode).
        m = jnp.max(s, axis=-1, keepdims=True)
        p = jnp.exp((s - m).astype(exp_dtype))
        l = jnp.sum(p, axis=-1, keepdims=True, dtype=jnp.float32)        # (TQ, 1)

        ctx = jnp.dot(p.astype(mm_dtype), vh,
                      preferred_element_type=jnp.float32)                # (TQ, hd)
        ctx = ctx * pl.reciprocal(l, approx=use_approx)

        # This head's contribution to the output projection.
        acc = acc + jnp.dot(ctx.astype(mm_dtype), wo_ref[lo:lo + head_dim, :],
                            preferred_element_type=jnp.float32)          # (TQ, H)

    o_ref[0] = (acc + bo_ref[...]).astype(o_ref.dtype)


def _tpu_generation():
    try:
        kind = jax.devices()[0].device_kind.lower()
    except Exception:
        return "unknown"
    if "v5e" in kind or "v5 lite" in kind or "v5lite" in kind:
        return "v5e"
    if "v6" in kind:
        return "v6e"
    if "v7" in kind or "7x" in kind:
        return "v7x"
    if "v5" in kind:
        return "v5p"
    if "v4" in kind:
        return "v4"
    return "other"


def _spec(shape, index_map, buffers=None):
    """BlockSpec, optionally requesting an explicit pipeline buffer count."""
    if buffers is not None:
        try:
            return pl.BlockSpec(shape, index_map, pipeline_mode=pl.Buffered(buffers))
        except Exception:   # older jax without pipeline_mode / Buffered
            pass
    return pl.BlockSpec(shape, index_map)


def cross_modal_attention(query_modality, kv_modality, wq, wkv, wo, bo, *,
                          num_heads, tile_q=None, pad_heads="auto",
                          attention_mask=None):
    """query_modality: (B, Sq, H), kv_modality: (B, Skv, H).
    Weights in PyTorch (out_features, in_features) layout; wkv is (2H, H)."""
    # TODO(synk): attention_mask path not wired in (needs -inf masking before exp).
    assert attention_mask is None, "attention_mask not supported yet"

    B, Sq, H = query_modality.shape
    _, Skv, _ = kv_modality.shape
    head_dim = H // num_heads
    assert head_dim * num_heads == H, "hidden_dim must be divisible by num_heads"
    scale = head_dim ** (-0.5)

    gen = _tpu_generation()
    two_cores = gen in ("v7x", "v5p", "v4")          # 2 TensorCores per chip

    # q-tile size: full Sq for short sequences; 128 on v5e, 256 on v6e/v7x.
    if tile_q is None:
        tile_q = 128 if gen == "v5e" else 256
    tq = Sq if Sq <= tile_q else tile_q
    n_q = pl.cdiv(Sq, tq)

    # Optional per-head lane padding (auto: only when head_dim >= 64).
    if pad_heads == "auto":
        pad_heads = (head_dim % 128 != 0) and (head_dim >= 64)
    hd_p = ((head_dim + 127) // 128) * 128 if (pad_heads and head_dim % 128) else head_dim
    Hp = num_heads * hd_p

    # Hoist transposes (and the softmax scale) out of the kernel; optional zero
    # padding of per-head columns/rows so head slices land on 128-lane boundaries.
    wq_t = (wq * scale).T                 # (H, H)  (in, out), scale folded in
    wk_t = wkv[:H, :].T                   # (H, H)
    wv_t = wkv[H:, :].T                   # (H, H)
    wo_t = wo.T                           # (H, H)
    if hd_p != head_dim:
        def _pad_cols(w_t):
            w3 = w_t.reshape(H, num_heads, head_dim)
            w3 = jnp.pad(w3, ((0, 0), (0, 0), (0, hd_p - head_dim)))
            return w3.reshape(H, Hp)
        wq_t, wk_t, wv_t = _pad_cols(wq_t), _pad_cols(wk_t), _pad_cols(wv_t)
        wo3 = wo_t.reshape(num_heads, head_dim, H)
        wo_t = jnp.pad(wo3, ((0, 0), (0, hd_p - head_dim), (0, 0))).reshape(Hp, H)
    bo2 = bo.reshape(1, H)

    act_dtype = query_modality.dtype
    act_isz = jnp.dtype(act_dtype).itemsize
    w_isz = jnp.dtype(wq.dtype).itemsize
    is_bf16 = act_dtype == jnp.bfloat16
    bf16_exp = bool(is_bf16) and gen in ("v6e", "v7x")

    # Cache K/V in VMEM scratch across q-tiles of the same batch (q axis becomes
    # "arbitrary").  With B == 1 on a 2-TC chip, keep q "parallel" instead and
    # recompute K/V per tile so both cores stay busy.
    cache_kv = (n_q > 1) and (B >= 2 or not two_cores)
    dims = ("parallel", "arbitrary") if cache_kv else ("parallel", "parallel")

    # Single-buffer grid-invariant weights (and, on v7x, a large kv slab) when the
    # footprint matters; tiny cases keep default double-buffering.
    weight_bytes = (3 * H * Hp + Hp * H + H) * w_isz
    single_buf_w = weight_bytes > (4 << 20)
    kv_block_bytes = Skv * H * act_isz
    single_buf_kv = gen == "v7x" and 2 * kv_block_bytes > (8 << 20)
    w_buffers = 1 if single_buf_w else None
    kv_buffers = 1 if single_buf_kv else None

    kernel = partial(_cross_modal_attn_kernel, num_heads=num_heads,
                     head_dim=hd_p, cache_kv=cache_kv, bf16_exp=bf16_exp)

    scratch_shapes = []
    if cache_kv:
        scratch_shapes = [pltpu.VMEM((Skv, Hp), act_dtype),
                          pltpu.VMEM((Skv, Hp), act_dtype)]

    # VMEM budget with headroom, capped per generation (~56 MiB v7x, ~100 MiB else).
    w_buf = (1 if single_buf_w else 2) * weight_bytes
    qo_buf = 2 * 2 * tq * H * act_isz
    kv_buf = (1 if single_buf_kv else 2) * kv_block_bytes
    cache_bytes = 2 * Skv * Hp * act_isz if cache_kv else 0
    tmp_bytes = (4 * (tq * Hp + 2 * tq * Skv + tq * hd_p + tq * H)
                 + (0 if cache_kv else 2 * Skv * Hp * act_isz))
    needed = w_buf + qo_buf + kv_buf + cache_bytes + tmp_bytes
    cap_mib = {"v7x": 56, "v5e": 100, "v6e": 100, "v5p": 100}.get(gen, 64)
    vmem_limit = int(min(cap_mib << 20, max(32 << 20, needed * 3 // 2)))

    # Advisory cost estimate for XLA scheduling around the custom call.
    kv_proj_mult = 1 if cache_kv else n_q
    flops = 2 * B * (Sq * H * Hp                        # q proj
                     + kv_proj_mult * 2 * Skv * H * Hp  # k,v proj
                     + 2 * Sq * Skv * Hp                # qk^T + pv
                     + Sq * Hp * H)                     # out proj
    transcendentals = B * num_heads * Sq * Skv
    bytes_accessed = int((2 * B * Sq * H + B * Skv * H) * act_isz
                         + (3 * H * Hp + Hp * H + H) * w_isz)

    return pl.pallas_call(
        kernel,
        out_shape=jax.ShapeDtypeStruct((B, Sq, H), act_dtype),
        grid=(B, n_q),
        in_specs=[
            pl.BlockSpec((1, tq, H), lambda b, qi: (b, qi, 0)),          # q tile
            _spec((1, Skv, H), lambda b, qi: (b, 0, 0), kv_buffers),     # kv (full)
            _spec((H, Hp), lambda b, qi: (0, 0), w_buffers),             # Wq^T*scale
            _spec((H, Hp), lambda b, qi: (0, 0), w_buffers),             # Wk^T
            _spec((H, Hp), lambda b, qi: (0, 0), w_buffers),             # Wv^T
            _spec((Hp, H), lambda b, qi: (0, 0), w_buffers),             # Wo^T
            _spec((1, H), lambda b, qi: (0, 0), w_buffers),              # out bias
        ],
        out_specs=pl.BlockSpec((1, tq, H), lambda b, qi: (b, qi, 0)),
        scratch_shapes=scratch_shapes,
        compiler_params=pltpu.CompilerParams(
            dimension_semantics=dims,
            vmem_limit_bytes=vmem_limit),
        cost_estimate=pl.CostEstimate(flops=int(flops),
                                      transcendentals=int(transcendentals),
                                      bytes_accessed=bytes_accessed),
    )(query_modality, kv_modality, wq_t, wk_t, wv_t, wo_t, bo2)


def _reference(xq, xkv, wq, wkv, wo, bo, *, num_heads):
    # Pure-JAX reference mirroring the PyTorch forward (eval mode).
    B, Sq, H = xq.shape
    _, Skv, _ = xkv.shape
    hd = H // num_heads
    q = xq @ wq.T
    kv = xkv @ wkv.T
    k, v = kv[..., :H], kv[..., H:]
    q = q.reshape(B, Sq, num_heads, hd).transpose(0, 2, 1, 3)
    k = k.reshape(B, Skv, num_heads, hd).transpose(0, 2, 1, 3)
    v = v.reshape(B, Skv, num_heads, hd).transpose(0, 2, 1, 3)
    s = jnp.einsum('bhqd,bhkd->bhqk', q, k) * (hd ** -0.5)
    w = jax.nn.softmax(s, axis=-1)
    o = jnp.einsum('bhqk,bhkd->bhqd', w, v)
    o = o.transpose(0, 2, 1, 3).reshape(B, Sq, H)
    return o @ wo.T + bo


if __name__ == "__main__":
    B, Skv = 2, 8
    hidden_dim, num_heads = 32, 4

    key = jax.random.PRNGKey(0)
    k_xq, k_xq2, k_xkv, k_wq, k_wkv, k_wo, k_bo = jax.random.split(key, 7)

    xq8 = jax.random.normal(k_xq, (B, 8, hidden_dim), dtype=jnp.float32)
    xq16 = jax.random.normal(k_xq2, (B, 16, hidden_dim), dtype=jnp.float32)
    xkv = jax.random.normal(k_xkv, (B, Skv, hidden_dim), dtype=jnp.float32)

    # Deterministic "Linear"-style initialization, PyTorch (out, in) layout.
    w_scale = 1.0 / math.sqrt(hidden_dim)
    wq = jax.random.uniform(k_wq, (hidden_dim, hidden_dim), jnp.float32,
                            -w_scale, w_scale)
    wkv = jax.random.uniform(k_wkv, (2 * hidden_dim, hidden_dim), jnp.float32,
                             -w_scale, w_scale)
    wo = jax.random.uniform(k_wo, (hidden_dim, hidden_dim), jnp.float32,
                            -w_scale, w_scale)
    bo = jax.random.uniform(k_bo, (hidden_dim,), jnp.float32,
                            -w_scale, w_scale)

    # 1) f32, single q-tile per batch (K/V computed inline).
    out = jax.block_until_ready(
        cross_modal_attention(xq8, xkv, wq, wkv, wo, bo, num_heads=num_heads))
    ref = _reference(xq8, xkv, wq, wkv, wo, bo, num_heads=num_heads)
    assert out.shape == (B, 8, hidden_dim)
    assert jnp.allclose(out, ref, atol=1e-4, rtol=1e-4), "f32 mismatch vs reference"

    # 2) f32, two q-tiles per batch -> K/V projected once per batch into VMEM scratch.
    out2 = jax.block_until_ready(
        cross_modal_attention(xq16, xkv, wq, wkv, wo, bo, num_heads=num_heads,
                              tile_q=8))
    ref2 = _reference(xq16, xkv, wq, wkv, wo, bo, num_heads=num_heads)
    assert jnp.allclose(out2, ref2, atol=1e-4, rtol=1e-4), "cached-K/V mismatch"

    # 3) f32, per-head lane padding enabled (head_dim 8 -> 128 lanes per head).
    out3 = jax.block_until_ready(
        cross_modal_attention(xq16, xkv, wq, wkv, wo, bo, num_heads=num_heads,
                              tile_q=8, pad_heads=True))
    assert jnp.allclose(out3, ref2, atol=1e-4, rtol=1e-4), "padded-head mismatch"

    # 4) bf16 path (bf16 MXU operands, bf16 exp on v6e/v7x, approx reciprocal).
    to_bf16 = lambda a: a.astype(jnp.bfloat16)
    out_bf16 = jax.block_until_ready(
        cross_modal_attention(to_bf16(xq8), to_bf16(xkv), to_bf16(wq), to_bf16(wkv),
                              to_bf16(wo), to_bf16(bo), num_heads=num_heads))
    assert out_bf16.dtype == jnp.bfloat16
    assert jnp.allclose(out_bf16.astype(jnp.float32), ref, atol=5e-2, rtol=5e-2), \
        "bf16 mismatch vs f32 reference"

    print("KERNEL_OK")
</pallas_src>

<mosaic_0001>
module attributes {stable_mosaic.version = 11 : i64} {
  func.func @_cross_modal_attn_kernel(%arg0: i32, %arg1: i32, %arg2: memref<1x8x32xf32, #tpu.memory_space<vmem>>, %arg3: memref<1x8x32xf32, #tpu.memory_space<vmem>>, %arg4: memref<32x32xf32, #tpu.memory_space<vmem>>, %arg5: memref<32x32xf32, #tpu.memory_space<vmem>>, %arg6: memref<32x32xf32, #tpu.memory_space<vmem>>, %arg7: memref<32x32xf32, #tpu.memory_space<vmem>>, %arg8: memref<1x32xf32, #tpu.memory_space<vmem>>, %arg9: memref<1x8x32xf32, #tpu.memory_space<vmem>>) attributes {dimension_semantics = [#tpu.dimension_semantics<parallel>, #tpu.dimension_semantics<parallel>], iteration_bounds = array<i64: 2, 1>, scalar_prefetch = 0 : i64, scratch_operands = 0 : i64, tpu.core_type = #tpu.core_type<tc>, window_params = [{transform_indices = @transform_0, window_bounds = array<i64: 1, 8, 32>}, {transform_indices = @transform_1, window_bounds = array<i64: 1, 8, 32>}, {pipeline_mode = #tpu.pipeline_mode<synchronous>, transform_indices = @transform_2, window_bounds = array<i64: 32, 32>}, {pipeline_mode = #tpu.pipeline_mode<synchronous>, transform_indices = @transform_3, window_bounds = array<i64: 32, 32>}, {pipeline_mode = #tpu.pipeline_mode<synchronous>, transform_indices = @transform_4, window_bounds = array<i64: 32, 32>}, {pipeline_mode = #tpu.pipeline_mode<synchronous>, transform_indices = @transform_5, window_bounds = array<i64: 32, 32>}, {pipeline_mode = #tpu.pipeline_mode<synchronous>, transform_indices = @transform_6, window_bounds = array<i64: 1, 32>}, {transform_indices = @transform_7, window_bounds = array<i64: 1, 8, 32>}]} {
    %c0 = arith.constant 0 : index
    %c0_0 = arith.constant 0 : index
    %c0_1 = arith.constant 0 : index
    %0 = vector.load %arg2[%c0, %c0_0, %c0_1] : memref<1x8x32xf32, #tpu.memory_space<vmem>>, vector<1x8x32xf32>
    %1 = vector.shape_cast %0 : vector<1x8x32xf32> to vector<8x32xf32>
    %c0_2 = arith.constant 0 : index
    %c0_3 = arith.constant 0 : index
    %2 = vector.load %arg4[%c0_2, %c0_3] : memref<32x32xf32, #tpu.memory_space<vmem>>, vector<32x32xf32>
    %cst = arith.constant dense<0.000000e+00> : vector<8x32xf32>
    %3 = tpu.matmul %1, %2, %cst {dimension_numbers = #tpu.dot_dimension_numbers<[1], [0], [0], [1], [0, 0, 1, 1], [], []>} : vector<8x32xf32>, vector<32x32xf32>, vector<8x32xf32> -> vector<8x32xf32>
    %c0_4 = arith.constant 0 : index
    %c0_5 = arith.constant 0 : index
    %c0_6 = arith.constant 0 : index
    %4 = vector.load %arg3[%c0_4, %c0_5, %c0_6] : memref<1x8x32xf32, #tpu.memory_space<vmem>>, vector<1x8x32xf32>
    %5 = vector.shape_cast %4 : vector<1x8x32xf32> to vector<8x32xf32>
    %c0_7 = arith.constant 0 : index
    %c0_8 = arith.constant 0 : index
    %6 = vector.load %arg5[%c0_7, %c0_8] : memref<32x32xf32, #tpu.memory_space<vmem>>, vector<32x32xf32>
    %cst_9 = arith.constant dense<0.000000e+00> : vector<8x32xf32>
    %7 = tpu.matmul %5, %6, %cst_9 {dimension_numbers = #tpu.dot_dimension_numbers<[1], [0], [0], [1], [0, 0, 1, 1], [], []>} : vector<8x32xf32>, vector<32x32xf32>, vector<8x32xf32> -> vector<8x32xf32>
    %c0_10 = arith.constant 0 : index
    %c0_11 = arith.constant 0 : index
    %8 = vector.load %arg6[%c0_10, %c0_11] : memref<32x32xf32, #tpu.memory_space<vmem>>, vector<32x32xf32>
    %cst_12 = arith.constant dense<0.000000e+00> : vector<8x32xf32>
    %9 = tpu.matmul %5, %8, %cst_12 {dimension_numbers = #tpu.dot_dimension_numbers<[1], [0], [0], [1], [0, 0, 1, 1], [], []>} : vector<8x32xf32>, vector<32x32xf32>, vector<8x32xf32> -> vector<8x32xf32>
    %cst_13 = arith.constant 0.000000e+00 : f32
    %10 = vector.broadcast %cst_13 : f32 to vector<8x32xf32>
    %11 = vector.extract_strided_slice %3 {offsets = [0, 0], sizes = [8, 8], strides = [1, 1]} : vector<8x32xf32> to vector<8x8xf32>
    %12 = vector.extract_strided_slice %7 {offsets = [0, 0], sizes = [8, 8], strides = [1, 1]} : vector<8x32xf32> to vector<8x8xf32>
    %13 = vector.extract_strided_slice %9 {offsets = [0, 0], sizes = [8, 8], strides = [1, 1]} : vector<8x32xf32> to vector<8x8xf32>
    %cst_14 = arith.constant dense<0.000000e+00> : vector<8x8xf32>
    %14 = tpu.matmul %11, %12, %cst_14 {dimension_numbers = #tpu.dot_dimension_numbers<[1], [1], [0], [0], [0, 0, 1, 0], [], []>} : vector<8x8xf32>, vector<8x8xf32>, vector<8x8xf32> -> vector<8x8xf32>
    %cst_15 = arith.constant dense<0xFF800000> : vector<8xf32>
    %15 = vector.multi_reduction <maximumf>, %14, %cst_15 [1] : vector<8x8xf32> to vector<8xf32>
    %16 = vector.shape_cast %15 : vector<8xf32> to vector<8x1xf32>
    %17 = vector.broadcast %16 : vector<8x1xf32> to vector<8x8xf32>
    %18 = arith.subf %14, %17 : vector<8x8xf32>
    %19 = math.exp %18 : vector<8x8xf32>
    %cst_16 = arith.constant dense<0.000000e+00> : vector<8xf32>
    %20 = vector.multi_reduction <add>, %19, %cst_16 [1] : vector<8x8xf32> to vector<8xf32>
    %21 = vector.shape_cast %20 : vector<8xf32> to vector<8x1xf32>
    %cst_17 = arith.constant dense<0.000000e+00> : vector<8x8xf32>
    %22 = tpu.matmul %19, %13, %cst_17 {dimension_numbers = #tpu.dot_dimension_numbers<[1], [0], [0], [1], [0, 0, 1, 1], [], []>} : vector<8x8xf32>, vector<8x8xf32>, vector<8x8xf32> -> vector<8x8xf32>
    %23 = tpu.reciprocal %21 : vector<8x1xf32> -> vector<8x1xf32>
    %24 = vector.broadcast %23 : vector<8x1xf32> to vector<8x8xf32>
    %25 = arith.mulf %22, %24 : vector<8x8xf32>
    %c0_18 = arith.constant 0 : index
    %c0_19 = arith.constant 0 : index
    %26 = vector.load %arg7[%c0_18, %c0_19] : memref<32x32xf32, #tpu.memory_space<vmem>>, vector<8x32xf32>
    %cst_20 = arith.constant dense<0.000000e+00> : vector<8x32xf32>
    %27 = tpu.matmul %25, %26, %cst_20 {dimension_numbers = #tpu.dot_dimension_numbers<[1], [0], [0], [1], [0, 0, 1, 1], [], []>} : vector<8x8xf32>, vector<8x32xf32>, vector<8x32xf32> -> vector<8x32xf32>
    %28 = arith.addf %10, %27 : vector<8x32xf32>
    %29 = vector.extract_strided_slice %3 {offsets = [0, 8], sizes = [8, 8], strides = [1, 1]} : vector<8x32xf32> to vector<8x8xf32>
    %30 = vector.extract_strided_slice %7 {offsets = [0, 8], sizes = [8, 8], strides = [1, 1]} : vector<8x32xf32> to vector<8x8xf32>
    %31 = vector.extract_strided_slice %9 {offsets = [0, 8], sizes = [8, 8], strides = [1, 1]} : vector<8x32xf32> to vector<8x8xf32>
    %cst_21 = arith.constant dense<0.000000e+00> : vector<8x8xf32>
    %32 = tpu.matmul %29, %30, %cst_21 {dimension_numbers = #tpu.dot_dimension_numbers<[1], [1], [0], [0], [0, 0, 1, 0], [], []>} : vector<8x8xf32>, vector<8x8xf32>, vector<8x8xf32> -> vector<8x8xf32>
    %cst_22 = arith.constant dense<0xFF800000> : vector<8xf32>
    %33 = vector.multi_reduction <maximumf>, %32, %cst_22 [1] : vector<8x8xf32> to vector<8xf32>
    %34 = vector.shape_cast %33 : vector<8xf32> to vector<8x1xf32>
    %35 = vector.broadcast %34 : vector<8x1xf32> to vector<8x8xf32>
    %36 = arith.subf %32, %35 : vector<8x8xf32>
    %37 = math.exp %36 : vector<8x8xf32>
    %cst_23 = arith.constant dense<0.000000e+00> : vector<8xf32>
    %38 = vector.multi_reduction <add>, %37, %cst_23 [1] : vector<8x8xf32> to vector<8xf32>
    %39 = vector.shape_cast %38 : vector<8xf32> to vector<8x1xf32>
    %cst_24 = arith.constant dense<0.000000e+00> : vector<8x8xf32>
    %40 = tpu.matmul %37, %31, %cst_24 {dimension_numbers = #tpu.dot_dimension_numbers<[1], [0], [0], [1], [0, 0, 1, 1], [], []>} : vector<8x8xf32>, vector<8x8xf32>, vector<8x8xf32> -> vector<8x8xf32>
    %41 = tpu.reciprocal %39 : vector<8x1xf32> -> vector<8x1xf32>
    %42 = vector.broadcast %41 : vector<8x1xf32> to vector<8x8xf32>
    %43 = arith.mulf %40, %42 : vector<8x8xf32>
    %c8 = arith.constant 8 : index
    %c0_25 = arith.constant 0 : index
    %44 = vector.load %arg7[%c8, %c0_25] : memref<32x32xf32, #tpu.memory_space<vmem>>, vector<8x32xf32>
    %cst_26 = arith.constant dense<0.000000e+00> : vector<8x32xf32>
    %45 = tpu.matmul %43, %44, %cst_26 {dimension_numbers = #tpu.dot_dimension_numbers<[1], [0], [0], [1], [0, 0, 1, 1], [], []>} : vector<8x8xf32>, vector<8x32xf32>, vector<8x32xf32> -> vector<8x32xf32>
    %46 = arith.addf %28, %45 : vector<8x32xf32>
    %47 = vector.extract_strided_slice %3 {offsets = [0, 16], sizes = [8, 8], strides = [1, 1]} : vector<8x32xf32> to vector<8x8xf32>
    %48 = vector.extract_strided_slice %7 {offsets = [0, 16], sizes = [8, 8], strides = [1, 1]} : vector<8x32xf32> to vector<8x8xf32>
    %49 = vector.extract_strided_slice %9 {offsets = [0, 16], sizes = [8, 8], strides = [1, 1]} : vector<8x32xf32> to vector<8x8xf32>
    %cst_27 = arith.constant dense<0.000000e+00> : vector<8x8xf32>
    %50 = tpu.matmul %47, %48, %cst_27 {dimension_numbers = #tpu.dot_dimension_numbers<[1], [1], [0], [0], [0, 0, 1, 0], [], []>} : vector<8x8xf32>, vector<8x8xf32>, vector<8x8xf32> -> vector<8x8xf32>
    %cst_28 = arith.constant dense<0xFF800000> : vector<8xf32>
    %51 = vector.multi_reduction <maximumf>, %50, %cst_28 [1] : vector<8x8xf32> to vector<8xf32>
    %52 = vector.shape_cast %51 : vector<8xf32> to vector<8x1xf32>
    %53 = vector.broadcast %52 : vector<8x1xf32> to vector<8x8xf32>
    %54 = arith.subf %50, %53 : vector<8x8xf32>
    %55 = math.exp %54 : vector<8x8xf32>
    %cst_29 = arith.constant dense<0.000000e+00> : vector<8xf32>
    %56 = vector.multi_reduction <add>, %55, %cst_29 [1] : vector<8x8xf32> to vector<8xf32>
    %57 = vector.shape_cast %56 : vector<8xf32> to vector<8x1xf32>
    %cst_30 = arith.constant dense<0.000000e+00> : vector<8x8xf32>
    %58 = tpu.matmul %55, %49, %cst_30 {dimension_numbers = #tpu.dot_dimension_numbers<[1], [0], [0], [1], [0, 0, 1, 1], [], []>} : vector<8x8xf32>, vector<8x8xf32>, vector<8x8xf32> -> vector<8x8xf32>
    %59 = tpu.reciprocal %57 : vector<8x1xf32> -> vector<8x1xf32>
    %60 = vector.broadcast %59 : vector<8x1xf32> to vector<8x8xf32>
    %61 = arith.mulf %58, %60 : vector<8x8xf32>
    %c16 = arith.constant 16 : index
    %c0_31 = arith.constant 0 : index
    %62 = vector.load %arg7[%c16, %c0_31] : memref<32x32xf32, #tpu.memory_space<vmem>>, vector<8x32xf32>
    %cst_32 = arith.constant dense<0.000000e+00> : vector<8x32xf32>
    %63 = tpu.matmul %61, %62, %cst_32 {dimension_numbers = #tpu.dot_dimension_numbers<[1], [0], [0], [1], [0, 0, 1, 1], [], []>} : vector<8x8xf32>, vector<8x32xf32>, vector<8x32xf32> -> vector<8x32xf32>
    %64 = arith.addf %46, %63 : vector<8x32xf32>
    %65 = vector.extract_strided_slice %3 {offsets = [0, 24], sizes = [8, 8], strides = [1, 1]} : vector<8x32xf32> to vector<8x8xf32>
    %66 = vector.extract_strided_slice %7 {offsets = [0, 24], sizes = [8, 8], strides = [1, 1]} : vector<8x32xf32> to vector<8x8xf32>
    %67 = vector.extract_strided_slice %9 {offsets = [0, 24], sizes = [8, 8], strides = [1, 1]} : vector<8x32xf32> to vector<8x8xf32>
    %cst_33 = arith.constant dense<0.000000e+00> : vector<8x8xf32>
    %68 = tpu.matmul %65, %66, %cst_33 {dimension_numbers = #tpu.dot_dimension_numbers<[1], [1], [0], [0], [0, 0, 1, 0], [], []>} : vector<8x8xf32>, vector<8x8xf32>, vector<8x8xf32> -> vector<8x8xf32>
    %cst_34 = arith.constant dense<0xFF800000> : vector<8xf32>
    %69 = vector.multi_reduction <maximumf>, %68, %cst_34 [1] : vector<8x8xf32> to vector<8xf32>
    %70 = vector.shape_cast %69 : vector<8xf32> to vector<8x1xf32>
    %71 = vector.broadcast %70 : vector<8x1xf32> to vector<8x8xf32>
    %72 = arith.subf %68, %71 : vector<8x8xf32>
    %73 = math.exp %72 : vector<8x8xf32>
    %cst_35 = arith.constant dense<0.000000e+00> : vector<8xf32>
    %74 = vector.multi_reduction <add>, %73, %cst_35 [1] : vector<8x8xf32> to vector<8xf32>
    %75 = vector.shape_cast %74 : vector<8xf32> to vector<8x1xf32>
    %cst_36 = arith.constant dense<0.000000e+00> : vector<8x8xf32>
    %76 = tpu.matmul %73, %67, %cst_36 {dimension_numbers = #tpu.dot_dimension_numbers<[1], [0], [0], [1], [0, 0, 1, 1], [], []>} : vector<8x8xf32>, vector<8x8xf32>, vector<8x8xf32> -> vector<8x8xf32>
    %77 = tpu.reciprocal %75 : vector<8x1xf32> -> vector<8x1xf32>
    %78 = vector.broadcast %77 : vector<8x1xf32> to vector<8x8xf32>
    %79 = arith.mulf %76, %78 : vector<8x8xf32>
    %c24 = arith.constant 24 : index
    %c0_37 = arith.constant 0 : index
    %80 = vector.load %arg7[%c24, %c0_37] : memref<32x32xf32, #tpu.memory_space<vmem>>, vector<8x32xf32>
    %cst_38 = arith.constant dense<0.000000e+00> : vector<8x32xf32>
    %81 = tpu.matmul %79, %80, %cst_38 {dimension_numbers = #tpu.dot_dimension_numbers<[1], [0], [0], [1], [0, 0, 1, 1], [], []>} : vector<8x8xf32>, vector<8x32xf32>, vector<8x32xf32> -> vector<8x32xf32>
    %82 = arith.addf %64, %81 : vector<8x32xf32>
    %c0_39 = arith.constant 0 : index
    %c0_40 = arith.constant 0 : index
    %83 = vector.load %arg8[%c0_39, %c0_40] : memref<1x32xf32, #tpu.memory_space<vmem>>, vector<1x32xf32>
    %84 = vector.broadcast %83 : vector<1x32xf32> to vector<8x32xf32>
    %85 = arith.addf %82, %84 : vector<8x32xf32>
    %c0_41 = arith.constant 0 : index
    %c0_42 = arith.constant 0 : index
    %c0_43 = arith.constant 0 : index
    %86 = vector.load %arg9[%c0_41, %c0_42, %c0_43] : memref<1x8x32xf32, #tpu.memory_space<vmem>>, vector<1x8x32xf32>
    %87 = vector.shape_cast %86 : vector<1x8x32xf32> to vector<8x32xf32>
    %88 = vector.shape_cast %85 : vector<8x32xf32> to vector<1x8x32xf32>
    tpu.vector_store %arg9[%c0_41, %c0_42, %c0_43], %88 {strides = array<i32>} : memref<1x8x32xf32, #tpu.memory_space<vmem>>, vector<1x8x32xf32>,
    return
  }
  func.func @transform_0(%arg0: i32, %arg1: i32) -> (i32, i32, i32) {
    %c0_i32 = arith.constant 0 : i32
    %c0_i32_0 = arith.constant 0 : i32
    return %arg0, %arg1, %c0_i32 : i32, i32, i32
  }
  func.func @transform_1(%arg0: i32, %arg1: i32) -> (i32, i32, i32) {
    %c0_i32 = arith.constant 0 : i32
    %c0_i32_0 = arith.constant 0 : i32
    %c0_i32_1 = arith.constant 0 : i32
    return %arg0, %c0_i32, %c0_i32_0 : i32, i32, i32
  }
  func.func @transform_2(%arg0: i32, %arg1: i32) -> (i32, i32) {
    %c0_i32 = arith.constant 0 : i32
    %c0_i32_0 = arith.constant 0 : i32
    %c0_i32_1 = arith.constant 0 : i32
    return %c0_i32, %c0_i32_0 : i32, i32
  }
  func.func @transform_3(%arg0: i32, %arg1: i32) -> (i32, i32) {
    %c0_i32 = arith.constant 0 : i32
    %c0_i32_0 = arith.constant 0 : i32
    %c0_i32_1 = arith.constant 0 : i32
    return %c0_i32, %c0_i32_0 : i32, i32
  }
  func.func @transform_4(%arg0: i32, %arg1: i32) -> (i32, i32) {
    %c0_i32 = arith.constant 0 : i32
    %c0_i32_0 = arith.constant 0 : i32
    %c0_i32_1 = arith.constant 0 : i32
    return %c0_i32, %c0_i32_0 : i32, i32
  }
  func.func @transform_5(%arg0: i32, %arg1: i32) -> (i32, i32) {
    %c0_i32 = arith.constant 0 : i32
    %c0_i32_0 = arith.constant 0 : i32
    %c0_i32_1 = arith.constant 0 : i32
    return %c0_i32, %c0_i32_0 : i32, i32
  }
  func.func @transform_6(%arg0: i32, %arg1: i32) -> (i32, i32) {
    %c0_i32 = arith.constant 0 : i32
    %c0_i32_0 = arith.constant 0 : i32
    %c0_i32_1 = arith.constant 0 : i32
    return %c0_i32, %c0_i32_0 : i32, i32
  }
  func.func @transform_7(%arg0: i32, %arg1: i32) -> (i32, i32, i32) {
    %c0_i32 = arith.constant 0 : i32
    %c0_i32_0 = arith.constant 0 : i32
    return %arg0, %arg1, %c0_i32 : i32, i32, i32
  }
}

</mosaic_0001>

<bundles_post_ra>
// kernel: tpu_custom_call.1
= control target key start
LH: loop header
LB: loop body
LE: loop exit
PB: predicated region body
PF: predicated region fallthrough
CT: control target
= control target key end

     0   :  { %s2716_s0 = inlined_call_operand.hbm [shape: f32[2,8,32], index: 0, kind: input, shape index: {}]   ;;  %s2717_s1 = inlined_call_operand.hbm [shape: f32[2,8,32], index: 1, kind: input, shape index: {}]   ;;  %s2718_s2 = inlined_call_operand.hbm [shape: f32[32,32], index: 2, kind: input, shape index: {}]   ;;  %s2719_s3 = inlined_call_operand.hbm [shape: f32[32,32], index: 3, kind: input, shape index: {}]   ;;  %s2720_s4 = inlined_call_operand.hbm [shape: f32[32,32], index: 4, kind: input, shape index: {}]   ;;  %s2721_s5 = inlined_call_operand.hbm [shape: f32[32,32], index: 5, kind: input, shape index: {}]   ;;  %s2722_s6 = inlined_call_operand.vmem [shape: f32[1,32], index: 6, kind: input, shape index: {}]   ;;  %s2723_s7 = inlined_call_operand.hbm [shape: f32[2,8,32], index: 7, kind: output, shape index: {}]  }
   0x1   :  { %2725 = sst [smem:[#allocation20_spill]] %s2716_s0 }
   0x2   :  { %2726 = sst [smem:[#allocation21_spill]] %s2718_s2 }
   0x3   :  { %2727 = sst [smem:[#allocation22_spill]] %s2719_s3 }
   0x4   :  { %2728 = sst [smem:[#allocation23_spill]] %s2720_s4 }
   0x5   :  { %2729 = sst [smem:[#allocation24_spill]] %s2721_s5 }
   0x6   :  { %12 = vsyncpa [#allocation3], 0 }
   0x7   :  { %14 = vsyncpa [#allocation3 + $0x1], 0 }
   0x8   :  { %15 = vsyncpa [#allocation6], 0 }
   0x9   :  { %17 = vsyncpa [#allocation6 + $0x1], 0 }
   0xa   :  { %18 = vsyncpa [#allocation9], 0 }
   0xb   :  { %19 = vsyncpa [#allocation12], 0 }
   0xc   :  { %20 = vsyncpa [#allocation4], 0 }
   0xd   :  { %22 = vsyncpa [#allocation4 + $0x1], 0  ;;  %s2376_s24 = smov 0   ;;  %s2378_s25 = smov 0  }
   0xe   :  { %s2380_s26 = smov 0   ;;  %s2382_s27 = smov 0  }
   0xf   :  { %s2384_s28 = smov 0   ;;  %s2386_s29 = smov 0  }
  0x10 LB: > { %s2407_s30 = sadd.s32 4294967295, %s2320_s29   ;;  %p1759_p0 = scmp.ge.s32.totalorder %s2320_s29, 1  ;;  %s2320_s29 = sphi %s2386_s29, %s28_s29   ;;  %s2316_s28 = sphi %s2384_s28, %s2753_s28   ;;  %s2312_s27 = sphi %s2382_s27, %s2752_s27   ;;  %s2308_s26 = sphi %s2380_s26, %s2751_s26   ;;  %s2304_s25 = sphi %s2378_s25, %s2750_s25   ;;  %s2300_s24 = sphi %s2376_s24, %s2749_s24  }
  0x11   : > { %p2724_p1 = scmp.eq.s32.totalorder %s2407_s30, 0  ;;  %p232_p2 = scmp.lt.s32.totalorder %s2320_s29, 3 }
  0x12   : > { %s2322_s9 = smov [#allocation7]   ;;  %s2323_s12 = smov [#allocation8]  }
  0x13   : > { %p2412_p3 = pnand %p1759_p0, %p232_p2  ;;  %s244_s10 = sshll.u32 %s2322_s9, 4  ;;  %s245_s10 = int_to_ptr.vmem [resolvable:$true] %s244_s10 }
  0x14   : > { %s257_s13 = sshll.u32 %s2323_s12, 4  ;;  %s2324_s14 = smov [#allocation10]   ;;  %s258_s13 = int_to_ptr.vmem [resolvable:$true] %s257_s13 }
  0x15   : > { %p1955_p4 = pneg %p2412_p3  ;;  %s270_s15 = sshll.u32 %s2324_s14, 4  ;;  %s271_s15 = int_to_ptr.vmem [resolvable:$true] %s270_s15 }
  0x16   : > { %s2075_s16 = scalar_lea.vmem %s245_s10, 512  ;;  %p2083_p11 = scmp.lt.s32.totalorder %s245_s10, %s245_s10 }
  0x17   : > { %p2421_p6 = pnand %p1955_p4, %p2724_p1  ;;  %p2076_p8 = scmp.ne.s32.totalorder %s245_s10, %s2075_s16 }
  0x18   : > { %p2084_p12 = scmp.lt.s32.totalorder %s2075_s16, %s2075_s16 }
  0x19   : > { %p2066_p7 = pneg %p2421_p6 }
  0x1a   : > { %p2085_p13 = por %p2084_p12, %p2083_p11 }
  0x1b   : > { %p2078_p9 = pnand %p2076_p8, %p2066_p7 }
  0x1d   : > { %p2079_p10 = pneg %p2078_p9 }
  0x1f   : > { %p2086_p0 = pnand %p2085_p13, %p2079_p10 }
  0x21   : > { %2089 = shalt.err (!%p2086_p0)
}
  0x22   : > { %s2325_s17 = smov 128   ;;  %s2326_s18 = smov 8  }
  0x23   : > { %s2732_s2 = sld [smem:[#allocation21_spill]]  ;;  %s2101_s21 = scalar_lea.vmem %s258_s13, 512 }
  0x24   : > { %p2102_p2 = scmp.ne.s32.totalorder %s258_s13, %s2101_s21  ;;  %p2109_p9 = scmp.lt.s32.totalorder %s258_s13, %s258_s13 }
  0x25   : > { %p2110_p10 = scmp.lt.s32.totalorder %s2101_s21, %s2101_s21 }
  0x26   : > { %p2104_p4 = pnand %p2102_p2, %p2066_p7 }
  0x27   : > { %p2111_p11 = por %p2110_p10, %p2109_p9 }
  0x28   : > { %p2105_p8 = pneg %p2104_p4 }
  0x29   : > { %1958 = dma.hbm_to_vmem [thread:$0]  (!%p2421_p6), %s2732_s2, 512, %s245_s10, [#allocation6], %s2325_s17, %s2325_s17, %s2326_s18  }
  0x2a   : > { %p2112_p12 = pnand %p2111_p11, %p2105_p8 }
  0x2c   : > { %2115 = shalt.err (!%p2112_p12)
}
  0x2d   : > { %s2733_s3 = sld [smem:[#allocation22_spill]]  ;;  %s2127_s9 = scalar_lea.vmem %s271_s15, 512 }
  0x2e   : > { %p2128_p13 = scmp.ne.s32.totalorder %s271_s15, %s2127_s9  ;;  %p2135_p4 = scmp.lt.s32.totalorder %s271_s15, %s271_s15 }
  0x2f   : > { %p2136_p8 = scmp.lt.s32.totalorder %s2127_s9, %s2127_s9 }
  0x30   : > { %p2130_p0 = pnand %p2128_p13, %p2066_p7 }
  0x31   : > { %p2137_p9 = por %p2136_p8, %p2135_p4 }
  0x32   : > { %p2131_p2 = pneg %p2130_p0 }
  0x33   : > { %1961 = dma.hbm_to_vmem [thread:$0]  (!%p2421_p6), %s2733_s3, 512, %s258_s13, [#allocation9], %s2325_s17, %s2325_s17, %s2326_s18  }
  0x34   : > { %p2138_p10 = pnand %p2137_p9, %p2131_p2 }
  0x36   : > { %2141 = shalt.err (!%p2138_p10)
}
  0x37   : > { %s2734_s4 = sld [smem:[#allocation23_spill]]  ;;  %s2327_s13 = smov [#allocation11]  }
  0x38   : > { %s283_s14 = sshll.u32 %s2327_s13, 4  ;;  %s284_s14 = int_to_ptr.vmem [resolvable:$true] %s283_s14 }
  0x39   : > { %s2153_s16 = scalar_lea.vmem %s284_s14, 512  ;;  %p2161_p0 = scmp.lt.s32.totalorder %s284_s14, %s284_s14 }
  0x3a   : > { %p2154_p11 = scmp.ne.s32.totalorder %s284_s14, %s2153_s16  ;;  %p2162_p2 = scmp.lt.s32.totalorder %s2153_s16, %s2153_s16 }
  0x3c   : > { %p2156_p12 = pnand %p2154_p11, %p2066_p7  ;;  %p2163_p4 = por %p2162_p2, %p2161_p0 }
  0x3d   : > { %1964 = dma.hbm_to_vmem [thread:$0]  (!%p2421_p6), %s2734_s4, 512, %s271_s15, [#allocation9], %s2325_s17, %s2325_s17, %s2326_s18  }
  0x3e   : > { %p2157_p13 = pneg %p2156_p12 }
  0x40   : > { %p2164_p8 = pnand %p2163_p4, %p2157_p13 }
  0x42   : > { %2167 = shalt.err (!%p2164_p8)
}
  0x43   : > { %s2735_s5 = sld [smem:[#allocation24_spill]]  ;;  %s1758_s11 = sadd.s32 4294967294, %s2320_s29  }
  0x44   : > { %s40_s20 = sadd.s32 1, %s2316_s28  ;;  %s49_s21 = sadd.s32 1, %s2308_s26 }
  0x45   : > { %p42_p7 = scmp.ge.s32.totalorder %s40_s20, 2  ;;  %p56_p9 = scmp.ne.s32.totalorder %s2308_s26, %s2304_s25 }
  0x46   : > { %p57_p10 = scmp.eq.s32.totalorder %s2320_s29, 0  ;;  %p62_p12 = scmp.ne.s32.totalorder %s2304_s25, %s2300_s24 }
  0x47   : > { %s2755_s20 = smov (%p42_p7, %s40_s20), 0  ;;  %p225_p4 = scmp.eq.s32.totalorder %s1758_s11, 1 }
  0x48   : > { %p2479_p11 = por %p57_p10, %p56_p9  ;;  %p2490_p0 = por %p2724_p1, %p62_p12 }
  0x49   : > { %1967 = dma.hbm_to_vmem [thread:$0]  (!%p2421_p6), %s2735_s5, 512, %s284_s14, [#allocation12], %s2325_s17, %s2325_s17, %s2326_s18  }
  0x4a   : > { %s44_s17 = ssub.s32 %s2316_s28, %s2755_s20  ;;  %p219_p6 = scmp.eq.s32.totalorder %s2407_s30, 1 }
  0x4b   : > { %p47_p13 = scmp.eq.s32.totalorder %s44_s17, 0  ;;  %p2501_p8 = por %p225_p4, %p62_p12 }
  0x4c   : > { %p2494_p2 = por %p219_p6, %p56_p9  ;;  %p1983_p7 = scmp.lt.s32.totalorder %s2320_s29, 2 }
  0x4d   : > { %s2499_s9 = scalar_select %p47_p13, %s2308_s26, %s49_s21  }
  0x4e   : > { %s300_s12 = sand.u32 1, %s2308_s26   ;;  %s1766_s13 = sshll.u32 %s2316_s28, 7 }
  0x4f   : > { %s1765_s14 = sshll.u32 %s300_s12, 3  ;;  %s2740_s0 = sld [smem:[#allocation20_spill]] }
  0x50   : > { %s304_s17 = scalar_lea.vmem [#allocation2], %s1765_s14  ;;  %p2513_p9 = pnand %p1983_p7, %p2479_p11 }
  0x51   : > { %s312_s2 = sshll.u32 %s304_s17, 4  ;;  %s2520_s4 = scalar_lea.hbm %s2717_s1, %s1766_s13  ;;  %s313_s2 = int_to_ptr.vmem [resolvable:$true] %s312_s2 }
  0x52   : > { %s301_s5 = scalar_lea.sflag [#allocation3], %s300_s12  ;;  %p2170_p10 = pneg %p2513_p9 }
  0x53   : > { %s2181_s16 = scalar_lea.vmem %s313_s2, 128  ;;  %s2328_s22 = smov [#allocation2]  }
  0x54   : > { %p2182_p12 = scmp.ne.s32.totalorder %s313_s2, %s2181_s16  ;;  %s2186_s15 = sshll.u32 %s2328_s22, 4  ;;  %s2187_s15 = int_to_ptr.vmem [resolvable:$false] %s2186_s15 }
  0x55   : > { %s310_s19 = scalar_lea.hbm %s2740_s0, %s1766_s13  ;;  %s2188_s17 = scalar_lea.vmem %s2187_s15, 256 }
  0x56   : > { %p2184_p6 = pnand %p2182_p12, %p2170_p10  ;;  %p2189_p13 = scmp.lt.s32.totalorder %s313_s2, %s2187_s15 }
  0x57   : > { %p2190_p4 = scmp.lt.s32.totalorder %s2188_s17, %s2181_s16 }
  0x58   : > { %p2185_p11 = pneg %p2184_p6 }
  0x59   : > { %p2191_p7 = por %p2190_p4, %p2189_p13 }
  0x5b   : > { %p2192_p5 = pnand %p2191_p7, %p2185_p11 }
  0x5d   : > { %2195 = shalt.err (!%p2192_p5)
}
  0x5e   : > { %1971 = dma.hbm_to_vmem [thread:$0]  (!%p2513_p9), %s310_s19, 128, %s313_s2, %s301_s5  }
  0x5f   : > { %s319_s12 = sand.u32 1, %s2320_s29   ;;  %s323_s13 = scalar_lea.vmem [#allocation5], %s1765_s14 }
  0x60   : > { %s330_s11 = sshll.u32 %s323_s13, 4  ;;  %s320_s21 = scalar_lea.sflag [#allocation6], %s319_s12  ;;  %s331_s11 = int_to_ptr.vmem [resolvable:$true] %s330_s11 }
  0x61   : > { %s2209_s0 = scalar_lea.vmem %s331_s11, 128  ;;  %s2329_s16 = smov [#allocation5]  }
  0x62   : > { %p2210_p12 = scmp.ne.s32.totalorder %s331_s11, %s2209_s0  ;;  %s2214_s22 = sshll.u32 %s2329_s16, 4  ;;  %s2215_s22 = int_to_ptr.vmem [resolvable:$false] %s2214_s22 }
  0x63   : > { %s2216_s15 = scalar_lea.vmem %s2215_s22, 256  ;;  %p2217_p5 = scmp.lt.s32.totalorder %s331_s11, %s2215_s22 }
  0x64   : > { %p2212_p6 = pnand %p2210_p12, %p2170_p10  ;;  %p2218_p11 = scmp.lt.s32.totalorder %s2216_s15, %s2209_s0 }
  0x66   : > { %p2213_p1 = pneg %p2212_p6  ;;  %p2219_p13 = por %p2218_p11, %p2217_p5 }
  0x68   : > { %p2220_p4 = pnand %p2219_p13, %p2213_p1 }
  0x6a   : > { %2223 = shalt.err (!%p2220_p4)
}
  0x6b   : > { %1974 = dma.hbm_to_vmem [thread:$0]  (!%p2513_p9), %s2520_s4, 128, %s331_s11, %s320_s21  }
  0x6c   : > { %339 = sbr.rel (%p2412_p3) target bundleno = 2106 (0x83a), region = 48  ;;  %s2539_s2 = sand.u32 (!%p2412_p3), 1, %s2304_s25  }
  0x6d   : > { %s2542_s5 = sshll.u32 (!%p2412_p3), %s2539_s2, 3  ;;  %s342_s0 = scalar_lea.sflag (!%p2412_p3), [#allocation3], %s2539_s2 }
  0x6e   : > { %s345_s14 = scalar_lea.vmem (!%p2412_p3), [#allocation2], %s2542_s5 }
  0x71   : > { %2275 = dma.done.wait (%p2490_p0), %s342_s0, 128  }
  0x72   : > { %2277 = vsyncadd (%p2490_p0), %s342_s0, 4294967168  ;;  %s350_s3 = sand.u32 1, %s2407_s30   ;;  %s354_s8 = scalar_lea.vmem [#allocation5], %s2542_s5 }
  0x73   : > { %s351_s4 = scalar_lea.sflag [#allocation6], %s350_s3 }
  0x74   : > { %2279 = dma.done.wait (%p2490_p0), %s351_s4, 128  }
  0x75   : > { %2281 = vsyncadd (%p2490_p0), %s351_s4, 4294967168  ;;  %p2742_p1 = scmp.eq.s32.totalorder %s2407_s30, 0 }
  0x77   : > { %2283 = dma.done.wait (%p2742_p1), [#allocation6], 512   ;;  %p2743_p3 = pmov %p2742_p1 }
  0x78   : > { %p2744_p9 = pmov %p2742_p1 }
  0x79   : > { %2285 = vsyncadd (%p2743_p3), [#allocation6], 4294966784 }
  0x7a   : > { %2287 = dma.done.wait (%p2744_p9), [#allocation9], 1024   ;;  %p2745_p10 = pmov %p2742_p1 }
  0x7b   : > { %p2746_p7 = pmov %p2742_p1 }
  0x7c   : > { %2289 = vsyncadd (%p2745_p10), [#allocation9], 4294966272 }
  0x7d   : > { %2291 = dma.done.wait (%p2746_p7), [#allocation12], 512   ;;  %p2747_p12 = pmov %p2742_p1 }
  0x7e   : > { %v2330_v0 = vmov 0.0   ;;  %vm2331_vm0 = vmmov 0   ;;  %v410_v1 = vld [vmem:[#allocation7 + $0x18] sm:$0xff]  ;;  %v409_v3 = vld [vmem:[#allocation7 + $0x10] sm:$0xff]  ;;  %v408_v5 = vld [vmem:[#allocation7 + $0x8] sm:$0xff]  ;;  %vm411_vm1 = vcmask 261120  }
  0x7f   : > { %2293 = vsyncadd (%p2747_p12), [#allocation12], 4294966784  ;;  %1840 = vmatprep.subr.mxu0 %v2330_v0  ;;  %1851 = vmatprep.subr.mxu1 %v2330_v0  ;;  %v489_v2 = vld [vmem:[#allocation8 + $0x18] sm:$0xff]  ;;  %v488_v4 = vld [vmem:[#allocation8 + $0x10] sm:$0xff]  ;;  %vm637_vm2 = vcmask 64512   ;;  %s2332_s30 = smov 120  }
  0x80   : > { %1859 = vmatprep.mubr.msk.f32.mxu1 %vm2331_vm0, %v2330_v0  ;;  %1848 = vmatprep.mubr.msk.f32.mxu0 %vm2331_vm0, %v2330_v0  ;;  %v487_v6 = vld [vmem:[#allocation8 + $0x8] sm:$0xff]  ;;  %v407_v7 = vld [vmem:[#allocation7] sm:$0xff]  ;;  %v485_v9 = vld [vmem:[%s354_s8] sm:$0xff]  ;;  %s2333_s18 = smov 112   ;;  %s2334_s19 = smov 104  }
  0x81   : > { %1841 = vmatpush3.msra.mxu0 %v410_v1  ;;  %1852 = vmatpush3.msra.mxu1 %v489_v2  ;;  %v486_v8 = vld [vmem:[#allocation8] sm:$0xff]  ;;  %v566_v11 = vld [vmem:[#allocation10 + $0x18] sm:$0xff]  ;;  %v565_v12 = vld [vmem:[#allocation10 + $0x10] sm:$0xff]  ;;  %s1798_s13 = sshll.u32 %s2312_s27, 7  ;;  %s405_s11 = scalar_lea.vmem [#allocation13], %s2542_s5 }
  0x82   : > { %1842 = vmatprep.subr.mxu0 %v2330_v0  ;;  %1853 = vmatprep.subr.mxu1 %v2330_v0  ;;  %v406_v10 = vld [vmem:[%s345_s14] sm:$0xff]  ;;  %s1616_s21 = sshll.u32 %s405_s11, 4  ;;  %s1614_s15 = scalar_lea.hbm %s2723_s7, %s1798_s13  ;;  %s1617_s21 = int_to_ptr.vmem [resolvable:$true] %s1616_s21 }
  0x83   : > { %1843 = vmatpush3.msra.mxu0 %v409_v3  ;;  %1854 = vmatpush3.msra.mxu1 %v488_v4  ;;  %v564_v13 = vld [vmem:[#allocation10 + $0x8] sm:$0xff]  ;;  %v563_v14 = vld [vmem:[#allocation10] sm:$0xff]  ;;  %s1602_s0 = scalar_lea.sflag [#allocation4], %s2539_s2  ;;  %s2224_s14 = scalar_lea.vmem %s1617_s21, 128 }
  0x84   : > { %1844 = vmatprep.subr.mxu0 %v2330_v0  ;;  %1855 = vmatprep.subr.mxu1 %v2330_v0  ;;  %v798_v38 = vld [vmem:[#allocation11] sm:$0xff]  ;;  %v965_v41 = vld [vmem:[#allocation11 + $0x8] sm:$0xff]  ;;  %p2225_p0 = scmp.ne.s32.totalorder %s1617_s21, %s2224_s14  ;;  %s2335_s3 = smov [#allocation13]  }
  0x85   : > { %1845 = vmatpush3.msra.mxu0 %v408_v5  ;;  %1856 = vmatpush3.msra.mxu1 %v487_v6  ;;  %v1277_v6 = vld [vmem:[#allocation11 + $0x10] sm:$0xff]  ;;  %s2228_s27 = sshll.u32 %s2335_s3, 4  ;;  %s2229_s27 = int_to_ptr.vmem [resolvable:$false] %s2228_s27 }
  0x86   : > { %1846 = vmatprep.subr.mxu0 %v2330_v0  ;;  %1857 = vmatprep.subr.mxu1 %v2330_v0  ;;  %p2226_p6 = pnand %p2225_p0, %p2494_p2  ;;  %s2230_s5 = scalar_lea.vmem %s2229_s27, 256 }
  0x87   : > { %1847 = vmatpush3.msra.mxu0 %v407_v7  ;;  %1858 = vmatpush3.msra.mxu1 %v486_v8  ;;  %p2231_p11 = scmp.lt.s32.totalorder %s1617_s21, %s2229_s27  ;;  %p2232_p13 = scmp.lt.s32.totalorder %s2230_s5, %s2224_s14 }
  0x88   : > { %1860 = vmatmul.mubr.msk.f32.vlgmr.msra.gmra.mxu1 %vm411_vm1, %v485_v9  ;;  %1862 = vmatprep.subr.mxu0 %v2330_v0  ;;  %p2227_p5 = pneg %p2226_p6 }
  0x89   : > { %1849 = vmatmul.mubr.msk.f32.vlgmr.msra.gmra.mxu0 %vm411_vm1, %v406_v10  ;;  %1873 = vmatprep.subr.mxu1 %v2330_v0  ;;  %p2233_p4 = por %p2232_p13, %p2231_p11 }
  0x8a   : > { %1863 = vmatpush3.msra.mxu0 %v566_v11  ;;  %1870 = vmatprep.mubr.msk.f32.mxu0 %vm2331_vm0, %v2330_v0 }
  0x8b   : > { %1864 = vmatprep.subr.mxu0 %v2330_v0  ;;  %1875 = vmatprep.mubr.msk.f32.mxu1 %vm2331_vm0, %v2330_v0  ;;  %p2234_p1 = pnand %p2233_p4, %p2227_p5 }
  0x8c   : > { %1865 = vmatpush3.msra.mxu0 %v565_v12 }
  0x8d   : > { %1866 = vmatprep.subr.mxu0 %v2330_v0 }
  0x8e   : > { %1867 = vmatpush3.msra.mxu0 %v564_v13 }
  0x8f   : > { %1868 = vmatprep.subr.mxu0 %v2330_v0 }
  0x90   : > { %1869 = vmatpush3.msra.mxu0 %v563_v14 }
  0x91   : > { %1871 = vmatmul.mubr.msk.f32.vlgmr.msra.gmra.mxu0 %vm411_vm1, %v485_v9  ;;  %1883 = vmatprep.subr.mxu0 %v2330_v0 }
  0x92   : > { %1885 = vmatprep.mubr.msk.f32.mxu0 %vm2331_vm0, %v2330_v0 }
 0x148   : > { %v2599_v15 = vpop.f32.mrf.mxu1 }
 0x149   : > { %801 = vrot.lane.b32.xlu0 %v2599_v15, %s2332_s30  ;;  %1874 = vmatpush3.xpose.msk.msra.mxu1 %vm637_vm2, %v2599_v15  ;;  %v481_v16 = vpop.f32.mrf.mxu0 }
 0x14a   : > { %v1861_v17 = vpop.f32.mrf.mxu1  ;;  %1878 = vmatprep.subr.mxu1 %v2330_v0 }
 0x14b   : > { %v1850_v18 = vpop.f32.mrf.mxu0 }
 0x14c   : > { %1876 = vmatmul.mubr.msk.f32.vlgmr.msra.gmra.mxu1 %vm637_vm2, %v481_v16 }
 0x14d   : > { %799 = vrot.lane.b32.xlu0 %v481_v16, %s2332_s30  ;;  %1880 = vmatprep.mubr.msk.f32.mxu1 %vm2331_vm0, %v2330_v0 }
 0x151   : > { %v2608_v19 = vpop.f32.mrf.mxu0 }
 0x152   : > { %887 = vrot.lane.b32.xlu0 %v2608_v19, %s2332_s30  ;;  %1879 = vmatpush3.msra.mxu1 %v2608_v19 }
 0x153   : > { %v1872_v20 = vpop.f32.mrf.mxu0  ;;  %1888 = vmatprep.subr.mxu1 %v2330_v0 }
 0x156   : > { %1114 = vrot.lane.b32.xlu0 %v2599_v15, %s2333_s18 }
 0x1bb   : > { %v802_v21 = vpop.permute.xlu0 %801 }
 0x1bc   : > { %1884 = vmatpush3.xpose.msk.msra.mxu0 %vm637_vm2, %v802_v21  ;;  %v1517_v21 = vld [vmem:[#allocation11 + $0x18] sm:$0xff] }
 0x1bd   : > { %1893 = vmatprep.subr.mxu0 %v2330_v0 }
 0x1bf   : > { %v800_v22 = vpop.permute.xlu0 %799 }
 0x1c0   : > { %1886 = vmatmul.mubr.msk.f32.vlgmr.msra.gmra.mxu0 %vm637_vm2, %v800_v22 }
 0x1c1   : > { %1895 = vmatprep.mubr.msk.f32.mxu0 %vm2331_vm0, %v2330_v0  ;;  %1894 = vmatpush3.msra.mxu0 %v965_v41 }
 0x1c2   : > { %1903 = vmatprep.subr.mxu0 %v2330_v0 }
 0x1c4   : > { %v888_v33 = vpop.permute.xlu0 %887 }
 0x1c8   : > { %v1115_v42 = vpop.permute.xlu0 %1114 }
 0x20c   : > { %v710_v23 = vpop.f32.mrf.mxu1 }
 0x20d   : > { %v714_v24 = vsel %vm637_vm2, %v710_v23, -inf }
 0x20e   : > { %715 = vmax.xlane.f32.xlu1 %v714_v24  ;;  %v1877_v25 = vpop.f32.mrf.mxu1 }
 0x280   : > { %v873_v26 = vpop.f32.mrf.mxu0 }
 0x281   : > { %v877_v27 = vsel %vm637_vm2, %v873_v26, -inf }
 0x282   : > { %878 = vmax.xlane.f32.xlu1 %v877_v27  ;;  %v1887_v28 = vpop.f32.mrf.mxu0 }
 0x297   : > { %v716_v29 = vpop.xlane.xlu1 %715 }
 0x298   : > { %v717_v30 = vsub.f32 %v710_v23, %v716_v29 }
 0x29a   : > { %v718_v31 = vmul.f32 1.442695, %v717_v30 }
 0x29c   : > { %2048 = vpow2.f32 %v718_v31  ;;  %v1796_v31 = vld [vmem:[%s2722_s6] ss:$0 sm:$0xff] }
 0x2a9   : > { %v2049_v32 = vpop.eup %2048 }
 0x2aa   : > { %1881 = vmatmul.mubr.msk.f32.vlgmr.msra.gmra.mxu1 %vm637_vm2, %v2049_v32  ;;  %v720_v34 = vsel %vm637_vm2, %v2049_v32, 0.0 }
 0x2ab   : > { %721 = vadd.xlane.f32.xlu0 %v720_v34  ;;  %1889 = vmatpush3.msra.mxu1 %v888_v33 }
 0x2ac   : > { %1890 = vmatprep.mubr.msk.f32.mxu1 %vm2331_vm0, %v2330_v0  ;;  %1898 = vmatprep.subr.mxu1 %v2330_v0 }
 0x2c1   : > { %1199 = vrot.lane.b32.xlu0 %v2608_v19, %s2333_s18 }
 0x2c5   : > { %1352 = vrot.lane.b32.xlu0 %v481_v16, %s2334_s19 }
 0x30b   : > { %v879_v35 = vpop.xlane.xlu1 %878 }
 0x30c   : > { %v880_v36 = vsub.f32 %v873_v26, %v879_v35 }
 0x30e   : > { %v881_v37 = vmul.f32 1.442695, %v880_v36 }
 0x310   : > { %2050 = vpow2.f32 %v881_v37 }
 0x31d   : > { %v2051_v39 = vpop.eup %2050 }
 0x31e   : > { %1891 = vmatmul.mubr.msk.f32.vlgmr.msra.gmra.mxu1 %vm637_vm2, %v2051_v39  ;;  %v883_v40 = vsel %vm637_vm2, %v2051_v39, 0.0 }
 0x31f   : > { %884 = vadd.xlane.f32.xlu1 %v883_v40  ;;  %1899 = vmatpush3.msra.mxu1 %v798_v38 }
 0x320   : > { %1900 = vmatprep.mubr.msk.f32.mxu1 %vm2331_vm0, %v2330_v0  ;;  %1908 = vmatprep.subr.mxu1 %v2330_v0 }
 0x330   : > { %1112 = vrot.lane.b32.xlu1 %v481_v16, %s2333_s18 }
 0x334   : > { %v722_v43 = vpop.xlane.xlu0 %721 }
 0x335   : > { %2052 = vrcp.f32 %v722_v43 }
 0x338   : > { %v1200_v48 = vpop.permute.xlu0 %1199 }
 0x33c   : > { %v1353_v5 = vpop.permute.xlu0 %1352 }
 0x342   : > { %v2053_v44 = vpop.eup %2052 }
 0x36a   : > { %v792_v45 = vpop.f32.mrf.mxu1 }
 0x36b   : > { %v797_v46 = vmul.f32 %v2053_v44, %v792_v45 }
 0x36c   : > { %v1882_v47 = vpop.f32.mrf.mxu1 }
 0x36d   : > { %1901 = vmatmul.mubr.msk.f32.vlgmr.msra.gmra.mxu1 %vm637_vm2, %v797_v46 }
 0x36e   : > { %1909 = vmatpush3.msra.mxu1 %v1200_v48  ;;  %1910 = vmatprep.mubr.msk.f32.mxu1 %vm2331_vm0, %v2330_v0 }
 0x36f   : > { %1918 = vmatprep.subr.mxu1 %v2330_v0 }
 0x3a8   : > { %v885_v49 = vpop.xlane.xlu1 %884 }
 0x3a9   : > { %2054 = vrcp.f32 %v885_v49 }
 0x3ac   : > { %v1113_v54 = vpop.permute.xlu1 %1112 }
 0x3b6   : > { %v2055_v50 = vpop.eup %2054 }
 0x3de   : > { %v959_v51 = vpop.f32.mrf.mxu1 }
 0x3df   : > { %v964_v52 = vmul.f32 %v2055_v50, %v959_v51 }
 0x3e0   : > { %v1892_v53 = vpop.f32.mrf.mxu1 }
 0x3e1   : > { %1896 = vmatmul.mubr.msk.f32.vlgmr.msra.gmra.mxu0 %vm637_vm2, %v964_v52 }
 0x3e2   : > { %1904 = vmatpush3.xpose.msk.msra.mxu0 %vm637_vm2, %v1115_v42  ;;  %1905 = vmatprep.mubr.msk.f32.mxu0 %vm2331_vm0, %v2330_v0 }
 0x3e3   : > { %1913 = vmatprep.subr.mxu0 %v2330_v0 }
 0x3e5   : > { %1906 = vmatmul.mubr.msk.f32.vlgmr.msra.gmra.mxu0 %vm637_vm2, %v1113_v54 }
 0x3e6   : > { %1915 = vmatprep.mubr.msk.f32.mxu0 %vm2331_vm0, %v2330_v0  ;;  %1914 = vmatpush3.msra.mxu0 %v1277_v6 }
 0x3e7   : > { %1923 = vmatprep.subr.mxu0 %v2330_v0 }
 0x42d   : > { %v1108_v55 = vpop.f32.mrf.mxu1 }
 0x42f   : > { %v1902_v56 = vpop.f32.mrf.mxu1 }
 0x4a1   : > { %v1035_v57 = vpop.f32.mrf.mxu0 }
 0x4a2   : > { %v1109_v22 = vadd.f32 %v1108_v55, %v1035_v57 }
 0x4a3   : > { %v1897_v58 = vpop.f32.mrf.mxu0 }
 0x4a5   : > { %v1186_v59 = vpop.f32.mrf.mxu0 }
 0x4a6   : > { %v1190_v60 = vsel %vm637_vm2, %v1186_v59, -inf }
 0x4a7   : > { %1191 = vmax.xlane.f32.xlu1 %v1190_v60  ;;  %v1907_v61 = vpop.f32.mrf.mxu0 }
 0x4b8   : > { %1354 = vrot.lane.b32.xlu1 %v2599_v15, %s2334_s19 }
 0x530   : > { %v1192_v62 = vpop.xlane.xlu1 %1191 }
 0x531   : > { %v1193_v63 = vsub.f32 %v1186_v59, %v1192_v62 }
 0x533   : > { %v1194_v1 = vmul.f32 1.442695, %v1193_v63 }
 0x534   : > { %v1355_v3 = vpop.permute.xlu1 %1354 }
 0x535   : > { %2056 = vpow2.f32 %v1194_v1 }
 0x542   : > { %v2057_v2 = vpop.eup %2056 }
 0x543   : > { %1911 = vmatmul.mubr.msk.f32.vlgmr.msra.gmra.mxu1 %vm637_vm2, %v2057_v2  ;;  %v1196_v4 = vsel %vm637_vm2, %v2057_v2, 0.0 }
 0x544   : > { %1919 = vmatpush3.xpose.msk.msra.mxu1 %vm637_vm2, %v1355_v3  ;;  %1197 = vadd.xlane.f32.xlu0 %v1196_v4 }
 0x545   : > { %1920 = vmatprep.mubr.msk.f32.mxu1 %vm2331_vm0, %v2330_v0  ;;  %1928 = vmatprep.subr.mxu1 %v2330_v0 }
 0x547   : > { %1921 = vmatmul.mubr.msk.f32.vlgmr.msra.gmra.mxu1 %vm637_vm2, %v1353_v5 }
 0x548   : > { %1930 = vmatprep.mubr.msk.f32.mxu1 %vm2331_vm0, %v2330_v0  ;;  %1929 = vmatpush3.msra.mxu1 %v1517_v21 }
 0x55a   : > { %1439 = vrot.lane.b32.xlu0 %v2608_v19, %s2334_s19 }
 0x5cd   : > { %v1198_v7 = vpop.xlane.xlu0 %1197 }
 0x5ce   : > { %2058 = vrcp.f32 %v1198_v7 }
 0x5d1   : > { %v1440_v12 = vpop.permute.xlu0 %1439 }
 0x5db   : > { %v2059_v8 = vpop.eup %2058 }
 0x603   : > { %v1271_v9 = vpop.f32.mrf.mxu1 }
 0x604   : > { %v1276_v10 = vmul.f32 %v2059_v8, %v1271_v9 }
 0x605   : > { %v1912_v11 = vpop.f32.mrf.mxu1 }
 0x606   : > { %1916 = vmatmul.mubr.msk.f32.vlgmr.msra.gmra.mxu0 %vm637_vm2, %v1276_v10 }
 0x607   : > { %1924 = vmatpush3.msra.mxu0 %v1440_v12  ;;  %v1426_v13 = vpop.f32.mrf.mxu1  ;;  %1925 = vmatprep.mubr.msk.f32.mxu0 %vm2331_vm0, %v2330_v0 }
 0x608   : > { %v1430_v14 = vsel %vm637_vm2, %v1426_v13, -inf }
 0x609   : > { %1431 = vmax.xlane.f32.xlu1 %v1430_v14  ;;  %v1922_v15 = vpop.f32.mrf.mxu1 }
 0x692   : > { %v1432_v16 = vpop.xlane.xlu1 %1431 }
 0x693   : > { %v1433_v17 = vsub.f32 %v1426_v13, %v1432_v16 }
 0x695   : > { %v1434_v18 = vmul.f32 1.442695, %v1433_v17 }
 0x697   : > { %2060 = vpow2.f32 %v1434_v18 }
 0x6a4   : > { %v2061_v19 = vpop.eup %2060 }
 0x6a5   : > { %1926 = vmatmul.mubr.msk.f32.vlgmr.msra.gmra.mxu0 %vm637_vm2, %v2061_v19  ;;  %v1436_v20 = vsel %vm637_vm2, %v2061_v19, 0.0 }
 0x6a6   : > { %1437 = vadd.xlane.f32.xlu1 %v1436_v20 }
 0x6c6   : > { %v1347_v0 = vpop.f32.mrf.mxu0 }
 0x6c7   : > { %v1351_v23 = vadd.f32 %v1347_v0, %v1109_v22 }
 0x6c8   : > { %v1917_v24 = vpop.f32.mrf.mxu0 }
 0x72f   : > { %v1438_v25 = vpop.xlane.xlu1 %1437 }
 0x730   : > { %2062 = vrcp.f32 %v1438_v25 }
 0x73d   : > { %v2063_v26 = vpop.eup %2062 }
 0x765   : > { %v1511_v27 = vpop.f32.mrf.mxu0 }
 0x766   : > { %v1516_v28 = vmul.f32 %v2063_v26, %v1511_v27 }
 0x767   : > { %v1927_v29 = vpop.f32.mrf.mxu0 }
 0x768   : > { %1931 = vmatmul.mubr.msk.f32.vlgmr.msra.gmra.mxu1 %vm637_vm2, %v1516_v28 }
 0x828   : > { %v1587_v30 = vpop.f32.mrf.mxu1 }
 0x829   : > { %v1591_v32 = vadd.f32 %v1587_v30, %v1351_v23 }
 0x82a   : > { %v1932_v33 = vpop.f32.mrf.mxu1 }
 0x82b   : > { %v1599_v34 = vadd.f32 %v1796_v31, %v1591_v32 }
 0x82d   : > { %1600 = vst.msk [vmem:[%s405_s11] sm:$0xff] %vm411_vm1, %v1599_v34 }
 0x82e   : > { %2237 = shalt.err (!%p2234_p1)
}
 0x82f   : > { %s2238_s4 = scalar_lea.hbm %s1614_s15, 128  ;;  %s2242_s30 = scalar_lea.hbm %s2723_s7, 256 }
 0x830   : > { %p2239_p3 = scmp.ne.s32.totalorder %s1614_s15, %s2238_s4  ;;  %p2243_p7 = scmp.lt.s32.totalorder %s1614_s15, %s2723_s7 }
 0x831   : > { %p2244_p12 = scmp.lt.s32.totalorder %s2242_s30, %s2238_s4 }
 0x832   : > { %p2240_p9 = pnand %p2239_p3, %p2494_p2 }
 0x833   : > { %p2245_p0 = por %p2244_p12, %p2243_p7 }
 0x834   : > { %p2241_p10 = pneg %p2240_p9 }
 0x836   : > { %p2246_p6 = pnand %p2245_p0, %p2241_p10 }
 0x838   : > { %2249 = shalt.err (!%p2246_p6)
}
 0x839   : > { %1953 = dma.vmem_to_hbm [thread:$0]  (%p2494_p2), %s1617_s21, 128, %s1614_s15, %s1602_s0  }
 0x83a PF: > { %s1628_s17 = sand.u32 1, %s2300_s24   ;;  %p2748_p5 = scmp.ge.s32.totalorder %s2320_s29, 2 }
 0x83b   : > { %s1629_s12 = scalar_lea.sflag [#allocation4], %s1628_s17 }
 0x83c   : > { %p1976_p11 = pnand %p2748_p5, %p2501_p8 }
 0x83e   : > { %p1977_p13 = pneg %p1976_p11 }
 0x840   : > { %2295 = dma.done.wait (%p1977_p13), %s1629_s12, 128  }
 0x841   : > { %2297 = vsyncadd (%p1977_p13), %s1629_s12, 4294967168  ;;  %s28_s29 = sadd.s32 1, %s2320_s29   ;;  %s2749_s24 = smov %s2304_s25 }
 0x842   : > { %p25_p4 = scmp.ge.s32.totalorder %s28_s29, 4   ;;  %s2750_s25 = smov %s2308_s26 }
 0x843   : > { %s2751_s26 = smov %s2499_s9  ;;  %s2752_s27 = smov %s2316_s28 }
 0x844   : > { %s2753_s28 = smov %s2755_s20  ;;  %27 = sbr.rel (!%p25_p4) target bundleno = 16 (0x10), region = 122 }
 0x849   :  { %1634 = vsyncpa [#allocation3], 1 }
 0x84a   :  { %1636 = vsyncpa [#allocation3 + $0x1], 1 }
 0x84b   :  { %1637 = vsyncpa [#allocation6], 1 }
 0x84c   :  { %1639 = vsyncpa [#allocation6 + $0x1], 1 }
 0x84d   :  { %1640 = vsyncpa [#allocation9], 1 }
 0x84e   :  { %1641 = vsyncpa [#allocation12], 1 }
 0x84f   :  { %1642 = vsyncpa [#allocation4], 1 }
 0x850   :  { %1644 = vsyncpa [#allocation4 + $0x1], 1 }

</bundles_post_ra>
